<compile_context>
chip_gen: v7x
topology: tpu7x:2x2x1
jax: 0.10.0
libtpu: 0.0.40
codegen_flags: <defaults>
</compile_context>

<pallas_src>
import functools

import jax
import jax.numpy as jnp
from jax import lax
from jax.experimental import pallas as pl
from jax.experimental.pallas import tpu as pltpu

LANES = 128
MAX_BLOCK_ROWS = 8192  # (8192, 128) f32 = 4 MiB per input tile


def _precision_partials_kernel(x_ref, t_ref, sp_ref, spt_ref, *, rows, need_mask):
    """Per-block lane-dense partial sums of probs and probs*targets."""
    x = x_ref[...].astype(jnp.float32)
    t = t_ref[...].astype(jnp.float32)
    # sigmoid(x) == 0.5 * (tanh(x/2) + 1): single EUP op + 2 cheap VPU ops.
    p = 0.5 * (jnp.tanh(0.5 * x) + 1.0)
    pt = p * t

    def write(p_v, pt_v):
        # Reduce over sublanes only; keep a lane-dense (1, 1, 128) partial.
        sp_ref[...] = jnp.sum(p_v, axis=0, keepdims=True)[None]
        spt_ref[...] = jnp.sum(pt_v, axis=0, keepdims=True)[None]

    if need_mask:
        i = pl.program_id(0)
        last = pl.num_programs(0) - 1

        @pl.when(i == last)
        def _():
            # Only the final block can contain out-of-bounds (garbage) rows;
            # jnp.where after the compute also zeroes any NaN/Inf garbage.
            br = p.shape[0]
            row_ids = lax.broadcasted_iota(jnp.int32, p.shape, 0) + i * br
            valid = row_ids < rows
            write(jnp.where(valid, p, 0.0), jnp.where(valid, pt, 0.0))

        @pl.when(i != last)
        def _():
            write(p, pt)
    else:
        write(p, pt)


def precision_loss2(logits, targets, *, epsilon=1e-8, pos_weight=None,
                    max_block_rows=MAX_BLOCK_ROWS):
    """JAX/Pallas equivalent of PrecisionLoss2.forward."""
    assert logits.shape == targets.shape
    n = int(logits.size)

    # Keep native dtype: the kernel casts in-VMEM, so bf16/int8 inputs cut HBM
    # traffic with no wrapper copy.  Reshape is free for contiguous arrays.
    x_flat = logits.reshape(-1)
    t_flat = targets.reshape(-1)

    rows = n // LANES
    rem = n - rows * LANES

    sum_p = jnp.float32(0.0)
    sum_pt = jnp.float32(0.0)

    if rows > 0:
        if rem:
            x_main = x_flat[:rows * LANES]
            t_main = t_flat[:rows * LANES]
        else:
            x_main = x_flat          # zero-copy common path (numel % 128 == 0)
            t_main = t_flat
        x2 = x_main.reshape(rows, LANES)
        t2 = t_main.reshape(rows, LANES)

        block_rows = min(max_block_rows, rows)   # rows<=max -> full-dim block (legal)
        grid = pl.cdiv(rows, block_rows)
        need_mask = (rows % block_rows) != 0

        kernel = functools.partial(_precision_partials_kernel,
                                   rows=rows, need_mask=need_mask)

        in_blk = pl.BlockSpec((block_rows, LANES), lambda i: (i, 0))
        out_blk = pl.BlockSpec((1, 1, LANES), lambda i: (i, 0, 0))

        sp_parts, spt_parts = pl.pallas_call(
            kernel,
            out_shape=(jax.ShapeDtypeStruct((grid, 1, LANES), jnp.float32),
                       jax.ShapeDtypeStruct((grid, 1, LANES), jnp.float32)),
            grid_spec=pltpu.PrefetchScalarGridSpec(
                num_scalar_prefetch=0,
                grid=(grid,),
                in_specs=[in_blk, in_blk],
                out_specs=[out_blk, out_blk]),
            compiler_params=pltpu.CompilerParams(
                # Independent blocks -> megacore-shardable on v7x (measured
                # no-op on single-TC v5e/v6e).
                dimension_semantics=("parallel",),
                # 2 inputs x 2 buffers x 4 MiB = 16 MiB resident; raise the
                # scoped limit so v5e's 16 MiB default doesn't OOM.
                vmem_limit_bytes=48 << 20),
        )(x2, t2)

        sum_p = jnp.sum(sp_parts)
        sum_pt = jnp.sum(spt_parts)

    if rem:
        # <128-element tail handled in plain JAX: avoids materializing padded
        # copies of both full tensors (the old jnp.pad path).
        x_tail = x_flat[rows * LANES:].astype(jnp.float32)
        t_tail = t_flat[rows * LANES:].astype(jnp.float32)
        p_tail = jax.nn.sigmoid(x_tail)
        sum_p = sum_p + jnp.sum(p_tail)
        sum_pt = sum_pt + jnp.sum(p_tail * t_tail)

    # TP + FP == sum(probs); TP == pos_weight * sum(probs * targets).
    tp = sum_pt if pos_weight is None else sum_pt * jnp.float32(pos_weight)
    precision = tp / (sum_p + jnp.float32(epsilon))
    return 1.0 - precision


def _reference(logits, targets, epsilon, pos_weight):
    """Direct transcription of PrecisionLoss2.forward."""
    probs = jax.nn.sigmoid(logits.astype(jnp.float32))
    t = targets.astype(jnp.float32)
    if pos_weight is not None:
        t = t * pos_weight
    tp = jnp.sum(probs * t)
    fp = jnp.sum(probs * (1.0 - t))
    return 1.0 - tp / (tp + fp + epsilon)


if __name__ == "__main__":
    key = jax.random.PRNGKey(0)
    k1, k2, k3, k4, k5, k6 = jax.random.split(key, 6)

    # Module parameters (PrecisionLoss2.__init__).
    epsilon = 1e-8
    pos_weight = 2.0

    # 1) NCHW logits/targets, numel % 128 == 0 (zero-copy fast path).
    logits = jax.random.normal(k1, (2, 4, 16, 16), dtype=jnp.float32)
    targets = jax.random.bernoulli(k2, 0.3, (2, 4, 16, 16)).astype(jnp.float32)
    out = jax.block_until_ready(
        precision_loss2(logits, targets, epsilon=epsilon, pos_weight=pos_weight))
    ref = _reference(logits, targets, epsilon, pos_weight)
    assert jnp.allclose(out, ref, rtol=1e-5, atol=1e-5), (out, ref)

    # 2) pos_weight=None branch.
    out2 = jax.block_until_ready(
        precision_loss2(logits, targets, epsilon=epsilon, pos_weight=None))
    ref2 = _reference(logits, targets, epsilon, None)
    assert jnp.allclose(out2, ref2, rtol=1e-5, atol=1e-5), (out2, ref2)

    # 3) Odd shape (numel % 128 != 0): exercises the JAX tail path.
    logits_odd = jax.random.normal(k3, (2, 3, 7, 5), dtype=jnp.float32)
    targets_odd = jax.random.bernoulli(k4, 0.3, (2, 3, 7, 5)).astype(jnp.float32)
    out3 = jax.block_until_ready(
        precision_loss2(logits_odd, targets_odd, epsilon=epsilon, pos_weight=pos_weight))
    ref3 = _reference(logits_odd, targets_odd, epsilon, pos_weight)
    assert jnp.allclose(out3, ref3, rtol=1e-5, atol=1e-5), (out3, ref3)

    # 4) bf16 inputs (halves HBM traffic of this bandwidth-bound kernel).
    logits_bf = logits.astype(jnp.bfloat16)
    targets_bf = targets.astype(jnp.bfloat16)
    out4 = jax.block_until_ready(
        precision_loss2(logits_bf, targets_bf, epsilon=epsilon, pos_weight=pos_weight))
    ref4 = _reference(logits_bf, targets_bf, epsilon, pos_weight)
    assert jnp.allclose(out4, ref4, rtol=1e-5, atol=1e-5), (out4, ref4)

    # 5) Partial last row-block (rows % block_rows != 0): exercises in-kernel mask.
    logits_m = jax.random.normal(k5, (41, 128), dtype=jnp.float32)
    targets_m = jax.random.bernoulli(k6, 0.3, (41, 128)).astype(jnp.float32)
    out5 = jax.block_until_ready(
        precision_loss2(logits_m, targets_m, epsilon=epsilon, pos_weight=pos_weight,
                        max_block_rows=8))
    ref5 = _reference(logits_m, targets_m, epsilon, pos_weight)
    assert jnp.allclose(out5, ref5, rtol=1e-5, atol=1e-5), (out5, ref5)

    print("KERNEL_OK")
</pallas_src>

<mosaic_0001>
module attributes {stable_mosaic.version = 11 : i64} {
  func.func @_precision_partials_kernel(%arg0: i32, %arg1: memref<16x128xf32, #tpu.memory_space<vmem>>, %arg2: memref<16x128xf32, #tpu.memory_space<vmem>>, %arg3: memref<1x1x128xf32, #tpu.memory_space<vmem>>, %arg4: memref<1x1x128xf32, #tpu.memory_space<vmem>>) attributes {dimension_semantics = [#tpu.dimension_semantics<parallel>], iteration_bounds = array<i64: 1>, scalar_prefetch = 0 : i64, scratch_operands = 0 : i64, tpu.core_type = #tpu.core_type<tc>, window_params = [{transform_indices = @transform_0, window_bounds = array<i64: 16, 128>}, {transform_indices = @transform_1, window_bounds = array<i64: 16, 128>}, {transform_indices = @transform_2, window_bounds = array<i64: 1, 1, 128>}, {transform_indices = @transform_3, window_bounds = array<i64: 1, 1, 128>}]} {
    %c0 = arith.constant 0 : index
    %c0_0 = arith.constant 0 : index
    %0 = vector.load %arg1[%c0, %c0_0] : memref<16x128xf32, #tpu.memory_space<vmem>>, vector<16x128xf32>
    %c0_1 = arith.constant 0 : index
    %c0_2 = arith.constant 0 : index
    %1 = vector.load %arg2[%c0_1, %c0_2] : memref<16x128xf32, #tpu.memory_space<vmem>>, vector<16x128xf32>
    %cst = arith.constant 5.000000e-01 : f32
    %2 = vector.broadcast %cst : f32 to vector<16x128xf32>
    %3 = arith.mulf %2, %0 : vector<16x128xf32>
    %4 = math.tanh %3 : vector<16x128xf32>
    %cst_3 = arith.constant 1.000000e+00 : f32
    %5 = vector.broadcast %cst_3 : f32 to vector<16x128xf32>
    %6 = arith.addf %4, %5 : vector<16x128xf32>
    %cst_4 = arith.constant 5.000000e-01 : f32
    %7 = vector.broadcast %cst_4 : f32 to vector<16x128xf32>
    %8 = arith.mulf %7, %6 : vector<16x128xf32>
    %9 = arith.mulf %8, %1 : vector<16x128xf32>
    %cst_5 = arith.constant dense<0.000000e+00> : vector<128xf32>
    %10 = vector.multi_reduction <add>, %8, %cst_5 [0] : vector<16x128xf32> to vector<128xf32>
    %11 = vector.shape_cast %10 : vector<128xf32> to vector<1x128xf32>
    %12 = vector.shape_cast %11 : vector<1x128xf32> to vector<1x1x128xf32>
    %c0_6 = arith.constant 0 : index
    %c0_7 = arith.constant 0 : index
    %c0_8 = arith.constant 0 : index
    %13 = vector.load %arg3[%c0_6, %c0_7, %c0_8] : memref<1x1x128xf32, #tpu.memory_space<vmem>>, vector<1x1x128xf32>
    tpu.vector_store %arg3[%c0_6, %c0_7, %c0_8], %12 {strides = array<i32>} : memref<1x1x128xf32, #tpu.memory_space<vmem>>, vector<1x1x128xf32>,
    %cst_9 = arith.constant dense<0.000000e+00> : vector<128xf32>
    %14 = vector.multi_reduction <add>, %9, %cst_9 [0] : vector<16x128xf32> to vector<128xf32>
    %15 = vector.shape_cast %14 : vector<128xf32> to vector<1x128xf32>
    %16 = vector.shape_cast %15 : vector<1x128xf32> to vector<1x1x128xf32>
    %c0_10 = arith.constant 0 : index
    %c0_11 = arith.constant 0 : index
    %c0_12 = arith.constant 0 : index
    %17 = vector.load %arg4[%c0_10, %c0_11, %c0_12] : memref<1x1x128xf32, #tpu.memory_space<vmem>>, vector<1x1x128xf32>
    tpu.vector_store %arg4[%c0_10, %c0_11, %c0_12], %16 {strides = array<i32>} : memref<1x1x128xf32, #tpu.memory_space<vmem>>, vector<1x1x128xf32>,
    return
  }
  func.func @transform_0(%arg0: i32) -> (i32, i32) {
    %c0_i32 = arith.constant 0 : i32
    %c0_i32_0 = arith.constant 0 : i32
    return %arg0, %c0_i32 : i32, i32
  }
  func.func @transform_1(%arg0: i32) -> (i32, i32) {
    %c0_i32 = arith.constant 0 : i32
    %c0_i32_0 = arith.constant 0 : i32
    return %arg0, %c0_i32 : i32, i32
  }
  func.func @transform_2(%arg0: i32) -> (i32, i32, i32) {
    %c0_i32 = arith.constant 0 : i32
    %c0_i32_0 = arith.constant 0 : i32
    %c0_i32_1 = arith.constant 0 : i32
    return %arg0, %c0_i32, %c0_i32_0 : i32, i32, i32
  }
  func.func @transform_3(%arg0: i32) -> (i32, i32, i32) {
    %c0_i32 = arith.constant 0 : i32
    %c0_i32_0 = arith.constant 0 : i32
    %c0_i32_1 = arith.constant 0 : i32
    return %arg0, %c0_i32, %c0_i32_0 : i32, i32, i32
  }
}

</mosaic_0001>

<bundles_post_ra>
// kernel: tpu_custom_call.1
= control target key start
LH: loop header
LB: loop body
LE: loop exit
PB: predicated region body
PF: predicated region fallthrough
CT: control target
= control target key end

     0   :  { %9 = vsyncpa [#allocation3], 0  ;;  %s291_s0 = inlined_call_operand.hbm [shape: f32[16,128], index: 0, kind: input, shape index: {}]   ;;  %s292_s1 = inlined_call_operand.hbm [shape: f32[16,128], index: 1, kind: input, shape index: {}]   ;;  %s293_s2 = inlined_call_operand.hbm [shape: f32[1,1,128], index: 2, kind: output, shape index: {0}]   ;;  %s294_s3 = inlined_call_operand.hbm [shape: f32[1,1,128], index: 3, kind: output, shape index: {1}]  }
   0x1   :  { %10 = vsyncpa [#allocation6], 0 }
   0x2   :  { %11 = vsyncpa [#allocation4], 0 }
   0x3   :  { %12 = vsyncpa [#allocation9], 0  ;;  %s209_s12 = smov [#allocation2]   ;;  %s113_s16 = scalar_lea.hbm %s291_s0, 256 }
   0x4   :  { %s18_s13 = sshll.u32 %s209_s12, 4  ;;  %p114_p0 = scmp.ne.s32.totalorder %s291_s0, %s113_s16  ;;  %s19_s13 = int_to_ptr.vmem [resolvable:$true] %s18_s13 }
   0x5   :  { %p117_p1 = scmp.lt.u32.totalorder %s113_s16, %s291_s0 }
   0x7   :  { %p119_p2 = pnand %p117_p1, %p114_p0 }
   0x9   :  { %122 = shalt.err (!%p119_p2)
}
   0xa   :  { %s123_s21 = scalar_lea.vmem %s19_s13, 256  ;;  %p128_p4 = scmp.lt.s32.totalorder %s19_s13, %s19_s13 }
   0xb   :  { %p124_p3 = scmp.ne.s32.totalorder %s19_s13, %s123_s21  ;;  %p129_p5 = scmp.lt.s32.totalorder %s123_s21, %s123_s21 }
   0xd   :  { %p130_p6 = por %p129_p5, %p128_p4 }
   0xf   :  { %p131_p7 = pnand %p130_p6, %p124_p3 }
  0x11   :  { %134 = shalt.err (!%p131_p7)
}
  0x12   :  { %s210_s22 = smov 128   ;;  %s211_s23 = smov 8  }
  0x13   :  { %24 = dma.hbm_to_vmem [thread:$0]  %s291_s0, 256, %s19_s13, [#allocation3], %s210_s22, %s210_s22, %s211_s23  }
  0x14   :  { %s212_s26 = smov [#allocation5]   ;;  %s135_s30 = scalar_lea.hbm %s292_s1, 256 }
  0x15   :  { %s30_s27 = sshll.u32 %s212_s26, 4  ;;  %p136_p8 = scmp.ne.s32.totalorder %s292_s1, %s135_s30  ;;  %s31_s27 = int_to_ptr.vmem [resolvable:$true] %s30_s27 }
  0x16   :  { %p139_p9 = scmp.lt.u32.totalorder %s135_s30, %s292_s1 }
  0x18   :  { %p141_p10 = pnand %p139_p9, %p136_p8 }
  0x1a   :  { %144 = shalt.err (!%p141_p10)
}
  0x1b   :  { %s145_s8 = scalar_lea.vmem %s31_s27, 256  ;;  %p150_p12 = scmp.lt.s32.totalorder %s31_s27, %s31_s27 }
  0x1c   :  { %p146_p11 = scmp.ne.s32.totalorder %s31_s27, %s145_s8  ;;  %p151_p13 = scmp.lt.s32.totalorder %s145_s8, %s145_s8 }
  0x1e   :  { %p152_p0 = por %p151_p13, %p150_p12 }
  0x20   :  { %p153_p1 = pnand %p152_p0, %p146_p11 }
  0x22   :  { %156 = shalt.err (!%p153_p1)
}
  0x23   :  { %36 = dma.hbm_to_vmem [thread:$0]  %s292_s1, 256, %s31_s27, [#allocation6], %s210_s22, %s210_s22, %s211_s23  }
  0x24   :  { %201 = dma.done.wait [#allocation3], 256  }
  0x25   :  { %202 = vsyncadd [#allocation3], 4294967040 }
  0x26   :  { %203 = dma.done.wait [#allocation6], 256  }
  0x27   :  { %204 = vsyncadd [#allocation6], 4294967040  ;;  %v43_v0 = vld [vmem:[#allocation2] sm:$0xff]  ;;  %v44_v1 = vld [vmem:[#allocation2 + $0x8] sm:$0xff]  ;;  %s213_s1 = smov [#allocation7]   ;;  %s214_s11 = smov [#allocation8]  }
  0x28   :  { %v47_v2 = vmul.f32 0.5, %v43_v0  ;;  %v48_v3 = vmul.f32 0.5, %v44_v1  ;;  %v45_v8 = vld [vmem:[#allocation5] sm:$0xff]  ;;  %v46_v10 = vld [vmem:[#allocation5 + $0x8] sm:$0xff]  ;;  %s79_s10 = sshll.u32 %s213_s1, 4  ;;  %s89_s12 = sshll.u32 %s214_s11, 4  ;;  %s80_s10 = int_to_ptr.vmem [resolvable:$true] %s79_s10  ;;  %s259_s12 = int_to_ptr.vmem [resolvable:$true] %s89_s12 }
  0x29   :  { %s157_s13 = scalar_lea.vmem %s80_s10, 16  ;;  %s161_s14 = scalar_lea.vmem %s80_s10, 32 }
  0x2a   :  { %109 = vtanh.f32 %v47_v2  ;;  %p158_p2 = scmp.ne.s32.totalorder %s80_s10, %s157_s13  ;;  %p162_p3 = scmp.lt.s32.totalorder %s80_s10, %s80_s10 }
  0x2b   :  { %111 = vtanh.f32 %v48_v3  ;;  %p163_p4 = scmp.lt.s32.totalorder %s161_s14, %s157_s13 }
  0x2d   :  { %p164_p5 = por %p163_p4, %p162_p3 }
  0x2f   :  { %p165_p6 = pnand %p164_p5, %p158_p2 }
  0x34   :  { %v110_v4 = vpop.eup %109 }
  0x35   :  { %v112_v5 = vpop.eup %111  ;;  %v51_v6 = vadd.f32 1.0, %v110_v4 }
  0x36   :  { %v52_v7 = vadd.f32 1.0, %v112_v5 }
  0x37   :  { %v53_v9 = vmul.f32 0.5, %v51_v6 }
  0x38   :  { %v54_v11 = vmul.f32 0.5, %v52_v7 }
  0x39   :  { %v55_v12 = vmul.f32 %v53_v9, %v45_v8 }
  0x3a   :  { %v57_v13 = vadd.f32 %v54_v11, %v53_v9  ;;  %v56_v14 = vmul.f32 %v54_v11, %v46_v10 }
  0x3c   :  { %v58_v15 = vrot.slane %v57_v13, 4  ;;  %v65_v16 = vadd.f32 %v56_v14, %v55_v12 }
  0x3e   :  { %v59_v17 = vadd.f32 %v58_v15, %v57_v13  ;;  %v66_v18 = vrot.slane %v65_v16, 4 }
  0x40   :  { %v60_v19 = vrot.slane %v59_v17, 2  ;;  %v67_v20 = vadd.f32 %v66_v18, %v65_v16 }
  0x42   :  { %v61_v21 = vadd.f32 %v60_v19, %v59_v17  ;;  %v68_v22 = vrot.slane %v67_v20, 2 }
  0x44   :  { %v62_v23 = vrot.slane %v61_v21, 1  ;;  %v69_v24 = vadd.f32 %v68_v22, %v67_v20 }
  0x46   :  { %v63_v25 = vadd.f32 %v62_v23, %v61_v21  ;;  %v70_v26 = vrot.slane %v69_v24, 1 }
  0x48   :  { %64 = vst [vmem:[#allocation7] sm:$0x1] %v63_v25  ;;  %v71_v27 = vadd.f32 %v70_v26, %v69_v24 }
  0x49   :  { %168 = shalt.err (!%p165_p6)
}
  0x4a   :  { %s169_s17 = scalar_lea.hbm %s293_s2, 16 }
  0x4b   :  { %p170_p7 = scmp.ne.s32.totalorder %s293_s2, %s169_s17  ;;  %p173_p8 = scmp.lt.u32.totalorder %s169_s17, %s293_s2 }
  0x4d   :  { %p175_p9 = pnand %p173_p8, %p170_p7 }
  0x4f   :  { %178 = shalt.err (!%p175_p9)
}
  0x50   :  { %82 = dma.vmem_to_hbm [thread:$0]  %s80_s10, 16, %s293_s2, [#allocation4]   ;;  %72 = vst [vmem:[#allocation8] sm:$0x1] %v71_v27 }
  0x51   :  { %s179_s24 = scalar_lea.vmem %s259_s12, 16  ;;  %s183_s25 = scalar_lea.vmem %s259_s12, 32 }
  0x52   :  { %p180_p10 = scmp.ne.s32.totalorder %s259_s12, %s179_s24  ;;  %p184_p11 = scmp.lt.s32.totalorder %s259_s12, %s259_s12 }
  0x53   :  { %p185_p12 = scmp.lt.s32.totalorder %s183_s25, %s179_s24 }
  0x55   :  { %p186_p13 = por %p185_p12, %p184_p11 }
  0x57   :  { %p187_p0 = pnand %p186_p13, %p180_p10 }
  0x59   :  { %190 = shalt.err (!%p187_p0)
}
  0x5a   :  { %s191_s28 = scalar_lea.hbm %s294_s3, 16 }
  0x5b   :  { %p192_p1 = scmp.ne.s32.totalorder %s294_s3, %s191_s28  ;;  %p195_p2 = scmp.lt.u32.totalorder %s191_s28, %s294_s3 }
  0x5d   :  { %p197_p3 = pnand %p195_p2, %p192_p1 }
  0x5f   :  { %200 = shalt.err (!%p197_p3)
}
  0x60   :  { %92 = dma.vmem_to_hbm [thread:$0]  %s259_s12, 16, %s294_s3, [#allocation9]  }
  0x61   :  { %205 = dma.done.wait [#allocation4], 16  }
  0x62   :  { %206 = vsyncadd [#allocation4], 4294967280 }
  0x63   :  { %207 = dma.done.wait [#allocation9], 16  }
  0x64   :  { %208 = vsyncadd [#allocation9], 4294967280 }
  0x65   :  { %99 = vsyncpa [#allocation3], 1 }
  0x66   :  { %100 = vsyncpa [#allocation6], 1 }
  0x67   :  { %101 = vsyncpa [#allocation4], 1 }
  0x68   :  { %102 = vsyncpa [#allocation9], 1 }

</bundles_post_ra>
